<compile_context>
chip_gen: v7x
topology: tpu7x:2x2x1
jax: 0.10.0
libtpu: 0.0.40
codegen_flags: <defaults>
</compile_context>

<pallas_src>
import functools

import jax
import jax.numpy as jnp
from jax import lax
from jax.experimental import pallas as pl
from jax.experimental.pallas import tpu as pltpu

_LANES = 128
_SUBLANES = 8
_TARGET_STREAM_BYTES = 2 << 20          # ~2 MiB per streamed array per grid step
_VMEM_LIMIT_BYTES = 48 * 1024 * 1024    # fits v7x (64 MiB physical); fine on v5e/v6e


def _cdiv(a, b):
    return (a + b - 1) // b


def _choose_block_rows(total_rows, row_bytes):
    """Largest legal row block (multiple of 8, or the full dim) such that the widest
    streamed array moves ~_TARGET_STREAM_BYTES of HBM per grid step."""
    rows_for_target = max(1, _TARGET_STREAM_BYTES // max(1, row_bytes))
    if total_rows <= rows_for_target:
        return total_rows                        # single block; full dim is always legal
    rb = max(_SUBLANES, (rows_for_target // _SUBLANES) * _SUBLANES)
    return min(rb, total_rows)


def _as_rows_lanes(x):
    """Copy-less reshape to a lane-dense 2-D [rows, cols] view."""
    e = x.size
    if e % _LANES == 0:
        return x.reshape(e // _LANES, _LANES)
    if x.ndim >= 2:
        return x.reshape(-1, x.shape[-2] * x.shape[-1])
    return x.reshape(1, -1)


# ----------------------------------------------------------------------------
# Kernel 1: L1 loss (mean reduction) — the non-bayesian path
# ----------------------------------------------------------------------------
def _l1_sum_kernel(a_ref, b_ref, out_ref, acc_ref, *,
                   rows_total, block_rows, inner_blocks, mask_from_block):
    i = pl.program_id(1)

    @pl.when(i == 0)
    def _():
        acc_ref[...] = jnp.zeros_like(acc_ref)

    a = a_ref[...]
    b = b_ref[...]
    if a.dtype == b.dtype and a.dtype != jnp.float32:
        # Native low-precision sub+abs (bf16 VPU on v6e/v7x), upcast only for the add.
        diff = jnp.abs(a - b).astype(jnp.float32)
    else:
        diff = jnp.abs(a.astype(jnp.float32) - b.astype(jnp.float32))

    if mask_from_block is None:
        # No ragged tail and no duplicated steps: plain accumulate every step.
        acc_ref[...] += diff
    else:
        logical = pl.program_id(0) * inner_blocks + i   # logical (unclamped) block id
        is_edge = logical >= mask_from_block

        @pl.when(jnp.logical_not(is_edge))
        def _():
            acc_ref[...] += diff                        # fast path: no mask work

        @pl.when(is_edge)
        def _():
            rows_g = logical * block_rows + lax.broadcasted_iota(
                jnp.int32, diff.shape, 0)
            acc_ref[...] += jnp.where(rows_g < rows_total, diff, 0.0)

    @pl.when(i == pl.num_programs(1) - 1)
    def _():
        out_ref[0, 0] = jnp.sum(acc_ref[...])           # one cross-lane reduce per core


def l1_loss_pallas(oups, gt):
    """mean(|oups - gt|), equivalent to F.l1_loss(oups, gt)."""
    assert oups.shape == gt.shape, "l1 path expects identical shapes"
    a2 = _as_rows_lanes(oups)
    b2 = _as_rows_lanes(gt)
    rows, cols = a2.shape

    in_itemsize = max(a2.dtype.itemsize, b2.dtype.itemsize)   # real bytes, not f32
    rb = _choose_block_rows(rows, cols * in_itemsize)
    nblocks = _cdiv(rows, rb)
    n_par = 2 if nblocks >= 2 else 1             # shard streaming over v7x's 2 TCs
    inner = _cdiv(nblocks, n_par)

    ragged = (rows % rb) != 0
    has_dup = (n_par * inner) != nblocks
    if ragged:
        mask_from_block = nblocks - 1            # tail block (+ any duplicated steps)
    elif has_dup:
        mask_from_block = nblocks                # only duplicated steps need zeroing
    else:
        mask_from_block = None

    if has_dup:
        # Clamp the (at most one) duplicated tail step onto the previous step's block:
        # identical consecutive block index -> Pallas elides the re-fetch DMA.
        def in_map(p, i):
            return (jnp.minimum(p * inner + i, nblocks - 1), 0)
    else:
        def in_map(p, i):
            return (p * inner + i, 0)

    kernel = functools.partial(
        _l1_sum_kernel, rows_total=rows, block_rows=rb,
        inner_blocks=inner, mask_from_block=mask_from_block)

    partials = pl.pallas_call(
        kernel,
        out_shape=jax.ShapeDtypeStruct((n_par, 1), jnp.float32),
        grid=(n_par, inner),
        in_specs=[
            pl.BlockSpec((rb, cols), in_map),
            pl.BlockSpec((rb, cols), in_map),
        ],
        out_specs=pl.BlockSpec((1, 1), lambda p, i: (p, 0),
                               memory_space=pltpu.SMEM),
        scratch_shapes=[pltpu.VMEM((rb, cols), jnp.float32)],
        compiler_params=pltpu.CompilerParams(
            dimension_semantics=("parallel", "arbitrary"),
            vmem_limit_bytes=_VMEM_LIMIT_BYTES),
    )(a2, b2)

    out_dtype = jnp.promote_types(oups.dtype, gt.dtype)
    return (jnp.sum(partials) / float(oups.size)).astype(out_dtype)


# ----------------------------------------------------------------------------
# Kernel 2: bayesian per-element loss
#   loss = |gt - mean| / (std + 1e-6) + log(std + 1e-6)
# oups block is one contiguous [rb, 2*hw] slab: cols [0:hw)=mean, [hw:2hw)=std.
# ----------------------------------------------------------------------------
def _bayes_kernel(gt_ref, o_ref, out_ref, *, hw):
    gt = gt_ref[...].astype(jnp.float32)
    o = o_ref[...]
    mean = o[:, :hw].astype(jnp.float32)
    std = o[:, hw:].astype(jnp.float32) + jnp.float32(1e-6)
    loss = jnp.abs(gt - mean) * pl.reciprocal(std) + jnp.log(std)
    out_ref[...] = loss.astype(out_ref.dtype)


def bayesian_loss_pallas(oups, gt):
    """Elementwise bayesian loss. oups: [B,T,2,H,W], gt: [B,T,1,H,W]."""
    B, T, cg, H, W = gt.shape
    Bo, To, co, Ho, Wo = oups.shape
    assert (B, T, H, W) == (Bo, To, Ho, Wo) and cg == 1 and co == 2
    n = B * T
    hw = H * W
    out_dtype = jnp.promote_types(gt.dtype, oups.dtype)

    # Free reshapes only — no padding, no channel-slice temporaries, no extra HBM passes.
    g2 = gt.reshape(n, hw)                        # [n, hw]
    o2 = oups.reshape(n, 2 * hw)                  # [n, 2*hw]  (mean | std per row)

    row_bytes = max(2 * hw * o2.dtype.itemsize,   # widest streamed array per row
                    hw * g2.dtype.itemsize,
                    hw * jnp.dtype(out_dtype).itemsize)
    rb = _choose_block_rows(n, row_bytes)
    nblocks = _cdiv(n, rb)

    out2 = pl.pallas_call(
        functools.partial(_bayes_kernel, hw=hw),
        out_shape=jax.ShapeDtypeStruct((n, hw), out_dtype),
        grid=(nblocks,),
        in_specs=[
            pl.BlockSpec((rb, hw), lambda i: (i, 0)),        # gt
            pl.BlockSpec((rb, 2 * hw), lambda i: (i, 0)),    # oups (one contiguous DMA)
        ],
        out_specs=pl.BlockSpec((rb, hw), lambda i: (i, 0)),
        compiler_params=pltpu.CompilerParams(
            dimension_semantics=("parallel",),
            vmem_limit_bytes=_VMEM_LIMIT_BYTES),
    )(g2, o2)

    return out2.reshape(B, T, 1, H, W)


# ----------------------------------------------------------------------------
# lossfun equivalent
# ----------------------------------------------------------------------------
def lossfun_forward(gt, oups, bayesian=False):
    if bayesian:
        return bayesian_loss_pallas(oups, gt)
    return l1_loss_pallas(oups, gt)


if __name__ == "__main__":
    key = jax.random.PRNGKey(0)
    k1, k2, k3, k4, k5, k6, k7, k8, k9 = jax.random.split(key, 9)

    # gt:   [B, T, 1, H, W];  oups: [B, T, 2, H, W] (ch 0 = mean, ch 1 = std)
    B, T, H, W = 2, 4, 16, 16
    gt = jax.random.normal(k1, (B, T, 1, H, W), dtype=jnp.float32)
    oups_bayes = jnp.stack(
        [
            jax.random.normal(k2, (B, T, H, W), dtype=jnp.float32),      # mean
            jax.nn.softplus(jax.random.normal(k3, (B, T, H, W))) + 0.1,  # std > 0
        ],
        axis=2,
    ).astype(jnp.float32)

    # --- non-bayesian path: F.l1_loss(oups, gt) ---
    oups_l1 = oups_bayes[:, :, 0:1, :, :]
    loss_l1 = lossfun_forward(gt, oups_l1, bayesian=False)
    jax.block_until_ready(loss_l1)
    ref_l1 = jnp.mean(jnp.abs(oups_l1 - gt))
    assert jnp.allclose(loss_l1, ref_l1, atol=1e-5, rtol=1e-5), (loss_l1, ref_l1)

    # --- bayesian path: elementwise loss (H*W multiple of 128) ---
    loss_bayes = lossfun_forward(gt, oups_bayes, bayesian=True)
    jax.block_until_ready(loss_bayes)
    mean = oups_bayes[:, :, 0:1, :, :]
    std = oups_bayes[:, :, 1:2, :, :]
    ref_bayes = jnp.abs(gt - mean) / (std + 1e-6) + jnp.log(std + 1e-6)
    assert loss_bayes.shape == ref_bayes.shape
    assert jnp.allclose(loss_bayes, ref_bayes, atol=1e-4, rtol=1e-4)

    # --- medium L1 (single big block per core) ---
    a_m = jax.random.normal(k4, (2, 4, 1, 200, 200), dtype=jnp.float32)
    b_m = jax.random.normal(k5, (2, 4, 1, 200, 200), dtype=jnp.float32)
    loss_m = lossfun_forward(b_m, a_m, bayesian=False)
    jax.block_until_ready(loss_m)
    ref_m = jnp.mean(jnp.abs(a_m - b_m))
    assert jnp.allclose(loss_m, ref_m, atol=1e-6, rtol=1e-4), (loss_m, ref_m)

    # --- larger L1 exercising multi-block grid + TC split + ragged tail + dup step ---
    a_l = jax.random.normal(k6, (2, 4, 1, 384, 384), dtype=jnp.float32)
    b_l = jax.random.normal(k7, (2, 4, 1, 384, 384), dtype=jnp.float32)
    loss_l = lossfun_forward(b_l, a_l, bayesian=False)
    jax.block_until_ready(loss_l)
    ref_l = jnp.mean(jnp.abs(a_l - b_l))
    assert jnp.allclose(loss_l, ref_l, atol=1e-6, rtol=1e-4), (loss_l, ref_l)

    # --- bayesian path with H*W not a multiple of 128 (no padding; in-kernel split) ---
    H2, W2 = 16, 10
    gt2 = jax.random.normal(k8, (B, T, 1, H2, W2), dtype=jnp.float32)
    oups2 = jnp.stack(
        [
            jax.random.normal(k9, (B, T, H2, W2), dtype=jnp.float32),
            jax.nn.softplus(jax.random.normal(k9, (B, T, H2, W2))) + 0.1,
        ],
        axis=2,
    ).astype(jnp.float32)
    loss_b2 = lossfun_forward(gt2, oups2, bayesian=True)
    jax.block_until_ready(loss_b2)
    ref_b2 = (jnp.abs(gt2 - oups2[:, :, 0:1]) / (oups2[:, :, 1:2] + 1e-6)
              + jnp.log(oups2[:, :, 1:2] + 1e-6))
    assert loss_b2.shape == ref_b2.shape
    assert jnp.allclose(loss_b2, ref_b2, atol=1e-4, rtol=1e-4)

    print("KERNEL_OK")
</pallas_src>

<mosaic_0001>
module attributes {stable_mosaic.version = 11 : i64} {
  func.func @_l1_sum_kernel(%arg0: i32, %arg1: i32, %arg2: memref<16x128xf32, #tpu.memory_space<vmem>>, %arg3: memref<16x128xf32, #tpu.memory_space<vmem>>, %arg4: memref<1x1xf32, #tpu.memory_space<smem>>, %arg5: memref<16x128xf32, #tpu.memory_space<vmem>>) attributes {dimension_semantics = [#tpu.dimension_semantics<parallel>, #tpu.dimension_semantics<arbitrary>], iteration_bounds = array<i64: 1, 1>, scalar_prefetch = 0 : i64, scratch_operands = 1 : i64, tpu.core_type = #tpu.core_type<tc>, window_params = [{transform_indices = @transform_0, window_bounds = array<i64: 16, 128>}, {transform_indices = @transform_1, window_bounds = array<i64: 16, 128>}, {transform_indices = @transform_2, window_bounds = array<i64: 1, 1>}]} {
    %c0_i32 = arith.constant 0 : i32
    %0 = arith.cmpi eq, %arg1, %c0_i32 : i32
    %1 = arith.extui %0 : i1 to i32
    %c0_i32_0 = arith.constant 0 : i32
    %2 = arith.cmpi ne, %1, %c0_i32_0 : i32
    scf.if %2 {
      %cst = arith.constant 0.000000e+00 : f32
      %13 = vector.broadcast %cst : f32 to vector<16x128xf32>
      %c0_10 = arith.constant 0 : index
      %c0_11 = arith.constant 0 : index
      %14 = vector.load %arg5[%c0_10, %c0_11] : memref<16x128xf32, #tpu.memory_space<vmem>>, vector<16x128xf32>
      tpu.vector_store %arg5[%c0_10, %c0_11], %13 {strides = array<i32>} : memref<16x128xf32, #tpu.memory_space<vmem>>, vector<16x128xf32>,
    } else {
    }
    %c0 = arith.constant 0 : index
    %c0_1 = arith.constant 0 : index
    %3 = vector.load %arg2[%c0, %c0_1] : memref<16x128xf32, #tpu.memory_space<vmem>>, vector<16x128xf32>
    %c0_2 = arith.constant 0 : index
    %c0_3 = arith.constant 0 : index
    %4 = vector.load %arg3[%c0_2, %c0_3] : memref<16x128xf32, #tpu.memory_space<vmem>>, vector<16x128xf32>
    %5 = arith.subf %3, %4 : vector<16x128xf32>
    %6 = math.absf %5 : vector<16x128xf32>
    %c0_4 = arith.constant 0 : index
    %c0_5 = arith.constant 0 : index
    %7 = vector.load %arg5[%c0_4, %c0_5] : memref<16x128xf32, #tpu.memory_space<vmem>>, vector<16x128xf32>
    %8 = arith.addf %7, %6 : vector<16x128xf32>
    %c0_6 = arith.constant 0 : index
    %c0_7 = arith.constant 0 : index
    %9 = vector.load %arg5[%c0_6, %c0_7] : memref<16x128xf32, #tpu.memory_space<vmem>>, vector<16x128xf32>
    tpu.vector_store %arg5[%c0_6, %c0_7], %8 {strides = array<i32>} : memref<16x128xf32, #tpu.memory_space<vmem>>, vector<16x128xf32>,
    %c0_i32_8 = arith.constant 0 : i32
    %10 = arith.cmpi eq, %arg1, %c0_i32_8 : i32
    %11 = arith.extui %10 : i1 to i32
    %c0_i32_9 = arith.constant 0 : i32
    %12 = arith.cmpi ne, %11, %c0_i32_9 : i32
    scf.if %12 {
      %c0_10 = arith.constant 0 : index
      %c0_11 = arith.constant 0 : index
      %13 = vector.load %arg5[%c0_10, %c0_11] : memref<16x128xf32, #tpu.memory_space<vmem>>, vector<16x128xf32>
      %14 = vector.shape_cast %13 : vector<16x128xf32> to vector<1x16x128xf32>
      %cst = arith.constant dense<0.000000e+00> : vector<1xf32>
      %15 = vector.multi_reduction <add>, %14, %cst [1, 2] : vector<1x16x128xf32> to vector<1xf32>
      %16 = vector.shape_cast %15 : vector<1xf32> to vector<1x1x1xf32>
      %17 = vector.extract %16[0, 0, 0] : f32 from vector<1x1x1xf32>
      %c0_12 = arith.constant 0 : index
      %c0_13 = arith.constant 0 : index
      %18 = memref.load %arg4[%c0_12, %c0_13] : memref<1x1xf32, #tpu.memory_space<smem>>
      memref.store %17, %arg4[%c0_12, %c0_13] : memref<1x1xf32, #tpu.memory_space<smem>>
    } else {
    }
    return
  }
  func.func @transform_0(%arg0: i32, %arg1: i32) -> (i32, i32) {
    %c1_i32 = arith.constant 1 : i32
    %0 = arith.muli %arg0, %c1_i32 : i32
    %1 = arith.addi %0, %arg1 : i32
    %c0_i32 = arith.constant 0 : i32
    %c0_i32_0 = arith.constant 0 : i32
    return %1, %c0_i32 : i32, i32
  }
  func.func @transform_1(%arg0: i32, %arg1: i32) -> (i32, i32) {
    %c1_i32 = arith.constant 1 : i32
    %0 = arith.muli %arg0, %c1_i32 : i32
    %1 = arith.addi %0, %arg1 : i32
    %c0_i32 = arith.constant 0 : i32
    %c0_i32_0 = arith.constant 0 : i32
    return %1, %c0_i32 : i32, i32
  }
  func.func @transform_2(%arg0: i32, %arg1: i32) -> (i32, i32) {
    %c0_i32 = arith.constant 0 : i32
    %c0_i32_0 = arith.constant 0 : i32
    return %arg0, %c0_i32 : i32, i32
  }
}

</mosaic_0001>

<bundles_post_ra>
// kernel: tpu_custom_call.1
= control target key start
LH: loop header
LB: loop body
LE: loop exit
PB: predicated region body
PF: predicated region fallthrough
CT: control target
= control target key end

     0   :  { %7 = vsyncpa [#allocation4], 0  ;;  %s227_s0 = inlined_call_operand.hbm [shape: f32[16,128], index: 0, kind: input, shape index: {}]   ;;  %s228_s1 = inlined_call_operand.hbm [shape: f32[16,128], index: 1, kind: input, shape index: {}]   ;;  %s229_s2 = inlined_call_operand.hbm [shape: f32[1,1], index: 2, kind: output, shape index: {}]  }
   0x1   :  { %8 = vsyncpa [#allocation7], 0 }
   0x2   :  { %9 = vsyncpa [#allocation5], 0  ;;  %s171_s9 = smov [#allocation3]   ;;  %s111_s13 = scalar_lea.hbm %s227_s0, 256 }
   0x3   :  { %s19_s10 = sshll.u32 %s171_s9, 4  ;;  %p112_p0 = scmp.ne.s32.totalorder %s227_s0, %s111_s13  ;;  %s20_s10 = int_to_ptr.vmem [resolvable:$true] %s19_s10 }
   0x4   :  { %p115_p1 = scmp.lt.u32.totalorder %s111_s13, %s227_s0 }
   0x6   :  { %p117_p2 = pnand %p115_p1, %p112_p0 }
   0x8   :  { %120 = shalt.err (!%p117_p2)
}
   0x9   :  { %s121_s18 = scalar_lea.vmem %s20_s10, 256  ;;  %p126_p4 = scmp.lt.s32.totalorder %s20_s10, %s20_s10 }
   0xa   :  { %p122_p3 = scmp.ne.s32.totalorder %s20_s10, %s121_s18  ;;  %p127_p5 = scmp.lt.s32.totalorder %s121_s18, %s121_s18 }
   0xc   :  { %p128_p6 = por %p127_p5, %p126_p4 }
   0xe   :  { %p129_p7 = pnand %p128_p6, %p122_p3 }
  0x10   :  { %132 = shalt.err (!%p129_p7)
}
  0x11   :  { %s172_s19 = smov 128   ;;  %s173_s20 = smov 8  }
  0x12   :  { %25 = dma.hbm_to_vmem [thread:$0]  %s227_s0, 256, %s20_s10, [#allocation4], %s172_s19, %s172_s19, %s173_s20  }
  0x13   :  { %s174_s23 = smov [#allocation6]   ;;  %s133_s27 = scalar_lea.hbm %s228_s1, 256 }
  0x14   :  { %s35_s24 = sshll.u32 %s174_s23, 4  ;;  %p134_p8 = scmp.ne.s32.totalorder %s228_s1, %s133_s27  ;;  %s36_s24 = int_to_ptr.vmem [resolvable:$true] %s35_s24 }
  0x15   :  { %p137_p9 = scmp.lt.u32.totalorder %s133_s27, %s228_s1 }
  0x17   :  { %p139_p10 = pnand %p137_p9, %p134_p8 }
  0x19   :  { %142 = shalt.err (!%p139_p10)
}
  0x1a   :  { %s143_s4 = scalar_lea.vmem %s36_s24, 256  ;;  %p148_p12 = scmp.lt.s32.totalorder %s36_s24, %s36_s24 }
  0x1b   :  { %p144_p11 = scmp.ne.s32.totalorder %s36_s24, %s143_s4  ;;  %p149_p13 = scmp.lt.s32.totalorder %s143_s4, %s143_s4 }
  0x1d   :  { %p150_p0 = por %p149_p13, %p148_p12 }
  0x1f   :  { %p151_p1 = pnand %p150_p0, %p144_p11 }
  0x21   :  { %154 = shalt.err (!%p151_p1)
}
  0x22   :  { %41 = dma.hbm_to_vmem [thread:$0]  %s228_s1, 256, %s36_s24, [#allocation7], %s172_s19, %s172_s19, %s173_s20  }
  0x23   :  { %165 = dma.done.wait [#allocation4], 256  }
  0x24   :  { %166 = vsyncadd [#allocation4], 4294967040 }
  0x25   :  { %167 = dma.done.wait [#allocation7], 256  }
  0x26   :  { %168 = vsyncadd [#allocation7], 4294967040  ;;  %v58_v0 = vld [vmem:[#allocation3] sm:$0xff]  ;;  %v59_v1 = vld [vmem:[#allocation3 + $0x8] sm:$0xff]  ;;  %s155_s8 = scalar_lea.hbm %s229_s2, 16 }
  0x27   :  { %v60_v2 = vld [vmem:[#allocation6] sm:$0xff]  ;;  %v61_v3 = vld [vmem:[#allocation6 + $0x8] sm:$0xff]  ;;  %p156_p2 = scmp.ne.s32.totalorder %s229_s2, %s155_s8  ;;  %p159_p3 = scmp.lt.u32.totalorder %s155_s8, %s229_s2 }
  0x28   :  { %v62_v4 = vsub.f32 %v58_v0, %v60_v2  ;;  %v63_v5 = vsub.f32 %v59_v1, %v61_v3 }
  0x29   :  { %p161_p4 = pnand %p159_p3, %p156_p2 }
  0x2a   :  { %v64_v6 = vand.u32 2147483647, %v62_v4  ;;  %v65_v7 = vand.u32 2147483647, %v63_v5 }
  0x2c   :  { %v77_v8 = vadd.f32 %v65_v7, %v64_v6 }
  0x2e   :  { %78 = vadd.xlane.f32.xlu0 %v77_v8 }
  0xbb   :  { %v79_v9 = vpop.xlane.xlu0 %78 }
  0xbc   :  { %v80_v10 = vrot.slane %v79_v9, 4 }
  0xbe   :  { %v81_v11 = vadd.f32 %v80_v10, %v79_v9 }
  0xc0   :  { %v82_v12 = vrot.slane %v81_v11, 2 }
  0xc2   :  { %v83_v13 = vadd.f32 %v82_v12, %v81_v11 }
  0xc4   :  { %v84_v14 = vrot.slane %v83_v13, 1 }
  0xc6   :  { %v85_v15 = vadd.f32 %v84_v14, %v83_v13 }
  0xc8   :  { %104 = vpush %v85_v15 }
  0xf9   :  { %s105_s1 = spop %104 }
  0xfa   :  { %88 = sst [smem:[#allocation8]] %s105_s1 }
  0xfb   :  { %164 = shalt.err (!%p161_p4)
}
  0xfc   :  { %s175_s13 = smov [#allocation8]  }
  0xfd   :  { %96 = dma.smem_to_hbm %s175_s13, 16, %s229_s2, [#allocation5]  }
  0xfe   :  { %169 = dma.done.wait [#allocation5], 16  }
  0xff   :  { %170 = vsyncadd [#allocation5], 4294967280 }
 0x100   :  { %100 = sfence }
 0x101   :  { %101 = vsyncpa [#allocation4], 1 }
 0x102   :  { %102 = vsyncpa [#allocation7], 1 }
 0x103   :  { %103 = vsyncpa [#allocation5], 1 }

</bundles_post_ra>
